<compile_context>
chip_gen: v6e
topology: v6e:2x2x1
jax: 0.10.0
libtpu: 0.0.40
codegen_flags: <defaults>
</compile_context>

<pallas_src>
import functools

import jax
import jax.numpy as jnp
from jax.experimental import pallas as pl
from jax.experimental.pallas import tpu as pltpu


def _truncated_loss_kernel(q, lqk, B, TB, bpc, nb,
                           logits_ref, tgt_ref, w_ref, out_ref):
    c = pl.program_id(0)          # core-split axis (size 1 or 2)
    i = pl.program_id(1)          # per-core reduction axis

    # Zero this core's accumulator slab on its first reduction step.
    @pl.when(i == 0)
    def _():
        out_ref[...] = jnp.zeros_like(out_ref)

    g = c * bpc + i                       # logical block id (may overshoot nb)
    gc = jnp.minimum(g, nb - 1)           # clamped id used for all data access

    x = logits_ref[...]                   # (TB, C) in the input's native dtype
    TBk, C = x.shape

    # Per-row validity: masks the ragged HBM tail (garbage rows) and any
    # duplicated overshoot block — logits are never padded in HBM.
    row = jax.lax.broadcasted_iota(jnp.int32, (TBk, 1), 0) + g * TB
    valid = row < B                                          # (TB, 1) bool

    # targets / per-sample weights: small VMEM-resident arrays, sliced here
    # instead of lane-width-1 per-step pipelined DMAs.
    if nb == 1:
        tgt = tgt_ref[...]                                   # (TB, 1) int32
        w = w_ref[...]                                       # (TB, 1) f32
    else:
        start = pl.multiple_of(gc * TB, 8)                   # TB % 8 == 0 here
        tgt = tgt_ref[pl.ds(start, TBk), :]
        w = w_ref[pl.ds(start, TBk), :]

    # Fused gather: pull the target logit out during the max pass (one sweep
    # over the block); the full softmax probability tensor is never formed.
    col = jax.lax.broadcasted_iota(jnp.int32, (TBk, C), 1)
    is_tgt = col == tgt
    m = jnp.max(x, axis=1, keepdims=True)                    # native dtype
    neg = jnp.asarray(-jnp.inf, dtype=x.dtype)
    x_tgt = jnp.max(jnp.where(is_tgt, x, neg), axis=1, keepdims=True)

    # exp / denominator accumulation in f32; only TB extra exps for the target.
    m32 = m.astype(jnp.float32)
    e = jnp.exp(x.astype(jnp.float32) - m32)                 # (TB, C) f32
    denom = jnp.sum(e, axis=1, keepdims=True)                # (TB, 1)
    e_tgt = jnp.exp(x_tgt.astype(jnp.float32) - m32)         # (TB, 1)
    yg = e_tgt * pl.reciprocal(denom, approx=False)          # exact (tolerance)

    loss = ((1.0 - yg ** q) * (1.0 / q) - lqk) * w           # (TB, 1)
    loss = jnp.where(valid, loss, 0.0)                       # NaN-safe masking
    out_ref[...] += jnp.sum(loss, keepdims=True)             # broadcast into slab


class TruncatedLossPallas:
    def __init__(self, q=0.7, k=0.5, trainset_size=50000):
        self.q = float(q)
        self.k = float(k)
        # weight parameter, deterministically initialized to ones (as in __init__).
        self.weight = jnp.ones((trainset_size, 1), dtype=jnp.float32)

    def __call__(self, logits, targets, indexes, block_rows=None):
        B, C = logits.shape
        itemsize = jnp.dtype(logits.dtype).itemsize

        # JAX glue: gather weight[indexes] -> (B, 1); 2-D int32 targets.
        w_sel = jnp.take(self.weight, indexes, axis=0).reshape(B, 1).astype(jnp.float32)
        tgt2d = targets.astype(jnp.int32).reshape(B, 1)

        # ---- tile sizing: ~2 MiB f32 working set per logits block ----------
        row_align = 8 if itemsize >= 4 else (16 if itemsize == 2 else 32)
        lane_c = max(C, 128)                 # lane padding of narrow class dims
        budget_rows = max(row_align, (2 * 1024 * 1024) // (lane_c * 4))
        tb_cap = max(row_align, (budget_rows // row_align) * row_align)
        if block_rows is not None:
            tb_cap = max(row_align, (int(block_rows) // row_align) * row_align)
        if tb_cap >= B:
            TB, nb = B, 1                    # one full-dim block, no ragged tail
        else:
            TB, nb = tb_cap, -(-B // tb_cap)

        # ---- TensorCore split: only on 2-TC chips (v7x) ---------------------
        NC = 1
        dims = ("arbitrary", "arbitrary")
        if nb >= 2 and hasattr(pltpu, "CORE_PARALLEL"):
            try:
                kind = jax.devices()[0].device_kind.lower()
            except Exception:
                kind = ""
            if "v7" in kind:
                NC = 2
                dims = (pltpu.CORE_PARALLEL, pltpu.ARBITRARY)
        bpc = -(-nb // NC)                   # blocks per core (overshoot masked)

        # Pad ONLY the tiny side arrays to the block grid (logits untouched).
        Bp = nb * TB
        if Bp != B:
            tgt2d = jnp.pad(tgt2d, ((0, Bp - B), (0, 0)))
            w_sel = jnp.pad(w_sel, ((0, Bp - B), (0, 0)))

        lqk = (1.0 - self.k ** self.q) / self.q
        kernel = functools.partial(_truncated_loss_kernel,
                                   self.q, lqk, B, TB, bpc, nb)

        cost = pl.CostEstimate(
            flops=8 * B * C,
            transcendentals=B * C + 3 * B,
            bytes_accessed=B * C * itemsize + Bp * 8 + NC * 8 * 128 * 4)

        out = pl.pallas_call(
            kernel,
            out_shape=jax.ShapeDtypeStruct((NC * 8, 128), jnp.float32),
            grid_spec=pltpu.PrefetchScalarGridSpec(
                num_scalar_prefetch=0,
                grid=(NC, bpc),
                in_specs=[
                    pl.BlockSpec((TB, C),
                                 lambda c, i: (jnp.minimum(c * bpc + i, nb - 1), 0)),
                    pl.BlockSpec(memory_space=pltpu.MemorySpace.VMEM),   # targets
                    pl.BlockSpec(memory_space=pltpu.MemorySpace.VMEM),   # w_sel
                ],
                out_specs=pl.BlockSpec((8, 128), lambda c, i: (c, 0)),
            ),
            compiler_params=pltpu.CompilerParams(
                dimension_semantics=dims,
                vmem_limit_bytes=32 * 1024 * 1024),
            cost_estimate=cost,
        )(logits, tgt2d, w_sel)              # logits in their original dtype

        partials = out[::8, 0]               # one partial sum per core
        return jnp.sum(partials) / B         # mean over the TRUE batch size


def _reference(logits, targets, indexes, weight, q, k):
    p = jax.nn.softmax(logits.astype(jnp.float32), axis=1)
    yg = jnp.take_along_axis(p, targets[:, None], axis=1)        # (B, 1)
    w = jnp.take(weight, indexes, axis=0)                        # (B, 1)
    loss = (1.0 - yg ** q) / q * w - (1.0 - k ** q) / q * w
    return jnp.mean(loss)


if __name__ == "__main__":
    key = jax.random.PRNGKey(0)

    # --- small case (single full-dim block) ---
    B, C = 8, 32
    trainset_size = 64
    k1, k2, k3 = jax.random.split(key, 3)
    logits = jax.random.normal(k1, (B, C), dtype=jnp.float32)
    targets = jax.random.randint(k2, (B,), 0, C, dtype=jnp.int32)
    indexes = jax.random.randint(k3, (B,), 0, trainset_size, dtype=jnp.int32)

    module = TruncatedLossPallas(q=0.7, k=0.5, trainset_size=trainset_size)
    loss = module(logits, targets, indexes)
    jax.block_until_ready(loss)
    ref = _reference(logits, targets, indexes, module.weight, module.q, module.k)
    assert jnp.allclose(loss, ref, atol=1e-5, rtol=1e-5), (loss, ref)

    # --- larger case: non-multiple-of-8 batch, single full-dim block ---
    B2, C2 = 300, 256
    trainset_size2 = 1024
    k4, k5, k6 = jax.random.split(jax.random.PRNGKey(1), 3)
    logits2 = jax.random.normal(k4, (B2, C2), dtype=jnp.float32)
    targets2 = jax.random.randint(k5, (B2,), 0, C2, dtype=jnp.int32)
    indexes2 = jax.random.randint(k6, (B2,), 0, trainset_size2, dtype=jnp.int32)

    module2 = TruncatedLossPallas(q=0.7, k=0.5, trainset_size=trainset_size2)
    loss2 = module2(logits2, targets2, indexes2)
    jax.block_until_ready(loss2)
    ref2 = _reference(logits2, targets2, indexes2, module2.weight, module2.q, module2.k)
    assert jnp.allclose(loss2, ref2, atol=1e-5, rtol=1e-5), (loss2, ref2)

    # --- same data, forced small blocks: exercises batch grid, ragged tail
    #     masking (no logits padding) and VMEM-resident target/weight slicing ---
    loss3 = module2(logits2, targets2, indexes2, block_rows=64)
    jax.block_until_ready(loss3)
    assert jnp.allclose(loss3, ref2, atol=1e-5, rtol=1e-5), (loss3, ref2)

    # --- bf16 logits: kernel keeps max/select in bf16, exp/sum in f32 ---
    B4, C4 = 128, 256
    k7, k8, k9 = jax.random.split(jax.random.PRNGKey(2), 3)
    logits4 = jax.random.normal(k7, (B4, C4), dtype=jnp.float32).astype(jnp.bfloat16)
    targets4 = jax.random.randint(k8, (B4,), 0, C4, dtype=jnp.int32)
    indexes4 = jax.random.randint(k9, (B4,), 0, trainset_size2, dtype=jnp.int32)
    loss4 = module2(logits4, targets4, indexes4)
    jax.block_until_ready(loss4)
    ref4 = _reference(logits4, targets4, indexes4, module2.weight, module2.q, module2.k)
    assert jnp.allclose(loss4, ref4, atol=1e-5, rtol=1e-5), (loss4, ref4)

    print("KERNEL_OK")
</pallas_src>

<mosaic_0001>
module attributes {stable_mosaic.version = 11 : i64} {
  func.func @_truncated_loss_kernel(%arg0: i32, %arg1: i32, %arg2: memref<8x32xf32, #tpu.memory_space<vmem>>, %arg3: memref<8x1xi32, #tpu.memory_space<vmem>>, %arg4: memref<8x1xf32, #tpu.memory_space<vmem>>, %arg5: memref<8x128xf32, #tpu.memory_space<vmem>>) attributes {dimension_semantics = [#tpu.dimension_semantics<arbitrary>, #tpu.dimension_semantics<arbitrary>], iteration_bounds = array<i64: 1, 1>, scalar_prefetch = 0 : i64, scratch_operands = 0 : i64, tpu.core_type = #tpu.core_type<tc>, window_params = [{transform_indices = @transform_0, window_bounds = array<i64: 8, 32>}, {pipeline_mode = #tpu.pipeline_mode<synchronous>, transform_indices = @transform_1, window_bounds = array<i64: 8, 1>}, {pipeline_mode = #tpu.pipeline_mode<synchronous>, transform_indices = @transform_2, window_bounds = array<i64: 8, 1>}, {transform_indices = @transform_3, window_bounds = array<i64: 8, 128>}]} {
    %c0_i32 = arith.constant 0 : i32
    %0 = arith.cmpi eq, %arg1, %c0_i32 : i32
    %1 = arith.extui %0 : i1 to i32
    %c0_i32_0 = arith.constant 0 : i32
    %2 = arith.cmpi ne, %1, %c0_i32_0 : i32
    scf.if %2 {
      %cst_20 = arith.constant 0.000000e+00 : f32
      %52 = vector.broadcast %cst_20 : f32 to vector<8x128xf32>
      %c0_21 = arith.constant 0 : index
      %c0_22 = arith.constant 0 : index
      %53 = vector.load %arg5[%c0_21, %c0_22] : memref<8x128xf32, #tpu.memory_space<vmem>>, vector<8x128xf32>
      tpu.vector_store %arg5[%c0_21, %c0_22], %52 {strides = array<i32>} : memref<8x128xf32, #tpu.memory_space<vmem>>, vector<8x128xf32>,
    } else {
    }
    %c1_i32 = arith.constant 1 : i32
    %3 = arith.muli %arg0, %c1_i32 : i32
    %4 = arith.addi %3, %arg1 : i32
    %c0 = arith.constant 0 : index
    %c0_1 = arith.constant 0 : index
    %5 = vector.load %arg2[%c0, %c0_1] : memref<8x32xf32, #tpu.memory_space<vmem>>, vector<8x32xf32>
    %6 = tpu.iota {dimensions = array<i32: 0>} : vector<8x1xi32>
    %c8_i32 = arith.constant 8 : i32
    %7 = arith.muli %4, %c8_i32 : i32
    %8 = vector.broadcast %7 : i32 to vector<8x1xi32>
    %9 = arith.addi %6, %8 : vector<8x1xi32>
    %c8_i32_2 = arith.constant 8 : i32
    %10 = vector.broadcast %c8_i32_2 : i32 to vector<8x1xi32>
    %11 = arith.cmpi slt, %9, %10 : vector<8x1xi32>
    %c0_3 = arith.constant 0 : index
    %c0_4 = arith.constant 0 : index
    %12 = vector.load %arg3[%c0_3, %c0_4] : memref<8x1xi32, #tpu.memory_space<vmem>>, vector<8x1xi32>
    %c0_5 = arith.constant 0 : index
    %c0_6 = arith.constant 0 : index
    %13 = vector.load %arg4[%c0_5, %c0_6] : memref<8x1xf32, #tpu.memory_space<vmem>>, vector<8x1xf32>
    %14 = tpu.iota {dimensions = array<i32: 1>} : vector<8x32xi32>
    %15 = vector.broadcast %12 : vector<8x1xi32> to vector<8x32xi32>
    %16 = arith.cmpi eq, %14, %15 : vector<8x32xi32>
    %cst = arith.constant dense<0xFF800000> : vector<8xf32>
    %17 = vector.multi_reduction <maximumf>, %5, %cst [1] : vector<8x32xf32> to vector<8xf32>
    %18 = vector.shape_cast %17 : vector<8xf32> to vector<8x1xf32>
    %cst_7 = arith.constant 0xFF800000 : f32
    %19 = vector.broadcast %cst_7 : f32 to vector<8x32xf32>
    %20 = arith.select %16, %5, %19 : vector<8x32xi1>, vector<8x32xf32>
    %cst_8 = arith.constant dense<0xFF800000> : vector<8xf32>
    %21 = vector.multi_reduction <maximumf>, %20, %cst_8 [1] : vector<8x32xf32> to vector<8xf32>
    %22 = vector.shape_cast %21 : vector<8xf32> to vector<8x1xf32>
    %23 = vector.broadcast %18 : vector<8x1xf32> to vector<8x32xf32>
    %24 = arith.subf %5, %23 : vector<8x32xf32>
    %25 = math.exp %24 : vector<8x32xf32>
    %cst_9 = arith.constant dense<0.000000e+00> : vector<8xf32>
    %26 = vector.multi_reduction <add>, %25, %cst_9 [1] : vector<8x32xf32> to vector<8xf32>
    %27 = vector.shape_cast %26 : vector<8xf32> to vector<8x1xf32>
    %28 = arith.subf %22, %18 : vector<8x1xf32>
    %29 = math.exp %28 : vector<8x1xf32>
    %30 = tpu.reciprocal %27 : vector<8x1xf32> -> vector<8x1xf32>
    %31 = arith.mulf %29, %30 : vector<8x1xf32>
    %cst_10 = arith.constant 0.699999988 : f32
    %32 = vector.broadcast %cst_10 : f32 to vector<8x1xf32>
    %33 = math.powf %31, %32 : vector<8x1xf32>
    %cst_11 = arith.constant 1.000000e+00 : f32
    %34 = vector.broadcast %cst_11 : f32 to vector<8x1xf32>
    %35 = arith.subf %34, %33 : vector<8x1xf32>
    %cst_12 = arith.constant 1.42857146 : f32
    %36 = vector.broadcast %cst_12 : f32 to vector<8x1xf32>
    %37 = arith.mulf %35, %36 : vector<8x1xf32>
    %cst_13 = arith.constant 0.549182534 : f32
    %38 = vector.broadcast %cst_13 : f32 to vector<8x1xf32>
    %39 = arith.subf %37, %38 : vector<8x1xf32>
    %40 = arith.mulf %39, %13 : vector<8x1xf32>
    %cst_14 = arith.constant 0.000000e+00 : f32
    %41 = vector.broadcast %cst_14 : f32 to vector<8x1xf32>
    %42 = arith.select %11, %40, %41 : vector<8x1xi1>, vector<8x1xf32>
    %c0_15 = arith.constant 0 : index
    %c0_16 = arith.constant 0 : index
    %43 = vector.load %arg5[%c0_15, %c0_16] : memref<8x128xf32, #tpu.memory_space<vmem>>, vector<8x128xf32>
    %44 = vector.shape_cast %42 : vector<8x1xf32> to vector<1x8x1xf32>
    %cst_17 = arith.constant dense<0.000000e+00> : vector<1xf32>
    %45 = vector.multi_reduction <add>, %44, %cst_17 [1, 2] : vector<1x8x1xf32> to vector<1xf32>
    %46 = vector.shape_cast %45 : vector<1xf32> to vector<1x1x1xf32>
    %47 = vector.extract %46[0, 0, 0] : f32 from vector<1x1x1xf32>
    %48 = vector.broadcast %47 : f32 to vector<1x1xf32>
    %49 = vector.broadcast %48 : vector<1x1xf32> to vector<8x128xf32>
    %50 = arith.addf %43, %49 : vector<8x128xf32>
    %c0_18 = arith.constant 0 : index
    %c0_19 = arith.constant 0 : index
    %51 = vector.load %arg5[%c0_18, %c0_19] : memref<8x128xf32, #tpu.memory_space<vmem>>, vector<8x128xf32>
    tpu.vector_store %arg5[%c0_18, %c0_19], %50 {strides = array<i32>} : memref<8x128xf32, #tpu.memory_space<vmem>>, vector<8x128xf32>,
    return
  }
  func.func @transform_0(%arg0: i32, %arg1: i32) -> (i32, i32) {
    %c1_i32 = arith.constant 1 : i32
    %0 = arith.muli %arg0, %c1_i32 : i32
    %1 = arith.addi %0, %arg1 : i32
    %c0_i32 = arith.constant 0 : i32
    %2 = arith.minsi %1, %c0_i32 : i32
    %c0_i32_0 = arith.constant 0 : i32
    %c0_i32_1 = arith.constant 0 : i32
    return %2, %c0_i32_0 : i32, i32
  }
  func.func @transform_1(%arg0: i32, %arg1: i32) -> (i32, i32) {
    %c0_i32 = arith.constant 0 : i32
    %c0_i32_0 = arith.constant 0 : i32
    %c0_i32_1 = arith.constant 0 : i32
    return %c0_i32, %c0_i32_0 : i32, i32
  }
  func.func @transform_2(%arg0: i32, %arg1: i32) -> (i32, i32) {
    %c0_i32 = arith.constant 0 : i32
    %c0_i32_0 = arith.constant 0 : i32
    %c0_i32_1 = arith.constant 0 : i32
    return %c0_i32, %c0_i32_0 : i32, i32
  }
  func.func @transform_3(%arg0: i32, %arg1: i32) -> (i32, i32) {
    %c0_i32 = arith.constant 0 : i32
    %c0_i32_0 = arith.constant 0 : i32
    return %arg0, %c0_i32 : i32, i32
  }
}

</mosaic_0001>

<bundles_post_ra>
// kernel: tpu_custom_call.1
= control target key start
LH: loop header
LB: loop body
LE: loop exit
PB: predicated region body
PF: predicated region fallthrough
CT: control target
= control target key end

     0   :  { %vm63_vm0 = vcmask 261120   ;;  %s225_s0 = inlined_call_operand.vmem [shape: f32[8,32], index: 0, kind: input, shape index: {}]   ;;  %s226_s1 = inlined_call_operand.vmem [shape: s32[8,1], index: 1, kind: input, shape index: {}]   ;;  %s227_s2 = inlined_call_operand.vmem [shape: f32[8,1], index: 2, kind: input, shape index: {}]   ;;  %s228_s3 = inlined_call_operand.hbm [shape: f32[8,128], index: 3, kind: output, shape index: {}]  }
   0x1   :  { %v48_v0 = vld [vmem:[%s225_s0] sm:$0xff] }
   0x2   :  { %8 = vsyncpa [#allocation3], 0  ;;  %v64_v1 = vsel %vm63_vm0, %v48_v0, -inf  ;;  %v188_v2 = vmov 0   ;;  %v55_v3 = vld [vmem:[%s226_s1] sm:$0xff]  ;;  %v57_v6 = vlaneseq  ;;  %vm89_vm7 = vcmask 7168  }
   0x3   :  { %155 = vset.pattern.permute.xlu0 %v188_v2  ;;  %v56_v32 = vld [vmem:[%s227_s2] sm:$0xff]  ;;  %s189_s16 = smov [#allocation2]  }
   0x4   :  { %65 = vmax.xlane.f32.xlu0 %v64_v1  ;;  %v58_v8 = vand.u32 127, %v57_v6  ;;  %s109_s17 = sshll.u32 %s189_s16, 4  ;;  %s110_s17 = int_to_ptr.vmem [resolvable:$true] %s109_s17 }
   0x5   :  { %s166_s2 = scalar_lea.vmem %s110_s17, 128  ;;  %p171_p1 = scmp.lt.s32.totalorder %s110_s17, %s110_s17 }
   0x6   :  { %p167_p0 = scmp.ne.s32.totalorder %s110_s17, %s166_s2  ;;  %p172_p2 = scmp.lt.s32.totalorder %s166_s2, %s166_s2 }
   0x8   :  { %p173_p3 = por %p172_p2, %p171_p1 }
   0xa   :  { %p174_p4 = pnand %p173_p3, %p167_p0 }
  0x1a   :  { %60 = vperm.xlu0 %155, %v55_v3  }
  0x8d   :  { %v66_v4 = vpop.xlane.xlu0 %65 }
  0x8e   :  { %v71_v5 = vsub.f32 %v48_v0, %v66_v4 }
  0x90   :  { %v72_v7 = vmul.f32 1.442695, %v71_v5 }
  0x92   :  { %156 = vpow2.f32 %v72_v7 }
  0x95   :  { %v61_v9 = vpop.permute.xlu0 %60 }
  0x96   :  { %vm62_vm1 = vcmp.eq.s32.totalorder %v58_v8, %v61_v9 }
  0x97   :  { %v67_v10 = vsel %vm62_vm1, %v48_v0, -inf }
  0x98   :  { %v68_v11 = vsel %vm63_vm0, %v67_v10, -inf }
  0x99   :  { %69 = vmax.xlane.f32.xlu1 %v68_v11 }
  0x9f   :  { %v157_v12 = vpop.eup %156 }
  0xa0   :  { %v74_v13 = vsel %vm63_vm0, %v157_v12, 0.0 }
  0xa1   :  { %75 = vadd.xlane.f32.xlu1 %v74_v13 }
 0x122   :  { %v70_v14 = vpop.xlane.xlu1 %69 }
 0x123   :  { %v77_v15 = vsub.f32 %v70_v14, %v66_v4 }
 0x125   :  { %v78_v16 = vmul.f32 1.442695, %v77_v15 }
 0x127   :  { %158 = vpow2.f32 %v78_v16 }
 0x12a   :  { %v76_v17 = vpop.xlane.xlu1 %75 }
 0x12b   :  { %160 = vrcp.f32 %v76_v17 }
 0x134   :  { %v159_v18 = vpop.eup %158 }
 0x138   :  { %v161_v19 = vpop.eup %160 }
 0x139   :  { %v81_v20 = vmul.f32 %v161_v19, %v159_v18 }
 0x13b   :  { %v128_v21 = vand.u32 2147483647, %v81_v20  ;;  %vm132_vm2 = vcmp.lt.f32.partialorder %v81_v20, 0  ;;  %vm133_vm3 = vcmp.eq.f32.partialorder %v81_v20, 0  ;;  %vm145_vm5 = vcmp.ne.f32.partialorder %v81_v20, %v81_v20 }
 0x13c   :  { %vm134_vm6 = vcmp.eq.f32.partialorder %v81_v20, 1065353216 }
 0x13d   :  { %162 = vlog2.f32 %v128_v21  ;;  %vm137_vm4 = vcmp.eq.f32.partialorder %v128_v21, 2139095040 }
 0x14a   :  { %v163_v22 = vpop.eup %162 }
 0x14b   :  { %v130_v23 = vmul.f32 0.7, %v163_v22 }
 0x14d   :  { %164 = vpow2.f32 %v130_v23 }
 0x15a   :  { %v165_v24 = vpop.eup %164 }
 0x15b   :  { %v138_v25 = vsel %vm132_vm2, 2143289344, %v165_v24 }
 0x15c   :  { %v139_v26 = vsel %vm133_vm3, 0, %v138_v25 }
 0x15d   :  { %v144_v27 = vsel %vm137_vm4, 2139095040, %v139_v26 }
 0x15e   :  { %v148_v28 = vsel %vm145_vm5, 2143289344, %v144_v27 }
 0x15f   :  { %v149_v29 = vsel %vm134_vm6, 1065353216, %v148_v28 }
 0x160   :  { %v83_v30 = vsub.f32 1.0, %v149_v29 }
 0x162   :  { %v84_v31 = vmul.f32 1.4285715, %v83_v30 }
 0x164   :  { %v123_v33 = vadd.f32 -0.54918253, %v84_v31 }
 0x166   :  { %v86_v34 = vmul.f32 %v123_v33, %v56_v32 }
 0x168   :  { %v90_v35 = vsel %vm89_vm7, %v86_v34, 0.0 }
 0x169   :  { %91 = vadd.xlane.f32.xlu1 %v90_v35 }
 0x1f2   :  { %v92_v36 = vpop.xlane.xlu1 %91 }
 0x1f3   :  { %v93_v37 = vrot.slane %v92_v36, 4 }
 0x1f5   :  { %v94_v38 = vadd.f32 %v93_v37, %v92_v36 }
 0x1f7   :  { %v95_v39 = vrot.slane %v94_v38, 2 }
 0x1f9   :  { %v96_v40 = vadd.f32 %v95_v39, %v94_v38 }
 0x1fb   :  { %v97_v41 = vrot.slane %v96_v40, 1 }
 0x1fd   :  { %v98_v42 = vadd.f32 %v97_v41, %v96_v40 }
 0x1ff   :  { %150 = vpush %v98_v42 }
 0x230   :  { %s151_s18 = spop %150 }
 0x231   :  { %v100_v43 = vstv %s151_s18 }
 0x232   :  { %102 = vst [vmem:[#allocation2] sm:$0xff] %v100_v43 }
 0x233   :  { %177 = shalt.err (!%p174_p4)
}
 0x234   :  { %112 = dma.vmem_to_hbm [thread:$0]  %s110_s17, 128, %s228_s3, [#allocation3]  }
 0x235   :  { %186 = dma.done.wait [#allocation3], 128  }
 0x236   :  { %187 = vsyncadd [#allocation3], 4294967168 }
 0x237   :  { %116 = vsyncpa [#allocation3], 1 }

</bundles_post_ra>
